<compile_context>
chip_gen: v7x
topology: tpu7x:2x2x1
jax: 0.10.0
libtpu: 0.0.40
codegen_flags: <defaults>
</compile_context>

<pallas_src>
import functools

import jax
import jax.numpy as jnp
from jax.experimental import pallas as pl
from jax.experimental.pallas import tpu as pltpu


def _cdiv(a, b):
    return (a + b - 1) // b


def _round_down(x, m):
    return (x // m) * m


def _vmem_capacity_bytes():
    try:
        return int(pltpu.get_tpu_info().vmem_capacity_bytes)
    except Exception:
        return 128 * 1024 * 1024  # v5e / v6e class fallback


def _bce_loss_kernel(pred_ref, gt_ref, n1_ref, n2_ref, row_ref, col_ref, out_ref,
                     *, binary_labels):
    # pred_ref / gt_ref : (bt, f_tile) native dtype
    # n1_ref / n2_ref   : (bt, 1) int32
    # row_ref / col_ref : (1, f_tile) int32  (precomputed row/col of each flattened element)
    p = pred_ref[...].astype(jnp.float32)
    y = gt_ref[...].astype(jnp.float32)
    n1 = n1_ref[...]
    n2 = n2_ref[...]
    row = row_ref[...]
    col = col_ref[...]

    # Valid-element mask; padded / out-of-bounds regions have row >= N1 or n1 == 0.
    mask = (row < n1) & (col < n2)                     # (bt, f_tile)

    # Make padded/garbage region log-safe BEFORE taking logs.
    p_safe = jnp.where(mask, p, jnp.float32(0.5))

    if binary_labels:
        # gt is guaranteed 0/1: one log per element.
        p_sel = jnp.where(y > jnp.float32(0.5), p_safe, 1.0 - p_safe)
        elem = -jnp.maximum(jnp.log(p_sel), jnp.float32(-100.0))
    else:
        # F.binary_cross_entropy semantics (log terms clamped at -100).
        log_p = jnp.maximum(jnp.log(p_safe), jnp.float32(-100.0))
        log_1mp = jnp.maximum(jnp.log(1.0 - p_safe), jnp.float32(-100.0))
        # y*log_p + (1-y)*log_1mp  ==  log_1mp + y*(log_p - log_1mp)
        elem = -(log_1mp + y * (log_p - log_1mp))

    elem = jnp.where(mask, elem, jnp.float32(0.0))

    # One partial sum per grid step; broadcast to the whole lane-dense (8,128) block.
    s = jnp.sum(elem)
    out_ref[...] = jnp.full(out_ref.shape, s, dtype=jnp.float32)


def regression_loss(pred_perm, gt_perm, n1_ns, n2_ns, *, binary_labels=False):
    """Cross-entropy loss between two permutations (Pallas TPU kernel)."""
    B, N1, N2 = pred_perm.shape
    F = N1 * N2

    n1_ns = n1_ns.astype(jnp.int32)
    n2_ns = n2_ns.astype(jnp.int32)

    # ---------------- per-generation tile sizing ----------------
    vmem_cap = _vmem_capacity_bytes()
    if vmem_cap <= 80 * 1024 * 1024:          # v7x-class: 64 MiB physical VMEM per TC
        tile_elems = 1 * 1024 * 1024
        vmem_limit = 48 * 1024 * 1024
    else:                                      # v5e / v6e: 128 MiB physical VMEM
        tile_elems = 2 * 1024 * 1024
        vmem_limit = 96 * 1024 * 1024

    # Feature-axis tiling (lane-aligned chunks). f_tile == F is always legal (full dim).
    f_tile_cap = max(128, _round_down(tile_elems // 8, 128))
    if F <= f_tile_cap:
        f_tile, gf = F, 1
    else:
        f_tile = f_tile_cap
        gf = _cdiv(F, f_tile)
    f_total = gf * f_tile

    # Batch-axis tiling. bt must be a multiple of 8 or equal to B.
    if B < 8:
        bt = B
    else:
        bt = max(8, min(_round_down(tile_elems // f_tile, 8), _round_down(B, 8)))
    gb = _cdiv(B, bt)
    # v7x megacore: guarantee >= 2 parallel grid steps when the batch allows it.
    if gb * gf == 1 and B >= 16:
        bt = max(8, _round_down(B // 2, 8))
        gb = _cdiv(B, bt)
    b_pad = gb * bt

    # ---------------- inputs: no copies of the big tensors ----------------
    pred2 = pred_perm.reshape(B, F)            # view-like reshape, native dtype
    gt2 = gt_perm.reshape(B, F)
    if b_pad != B:
        n1_col = jnp.pad(n1_ns, (0, b_pad - B)).reshape(b_pad, 1)   # zeros mask garbage rows
        n2_col = jnp.pad(n2_ns, (0, b_pad - B)).reshape(b_pad, 1)
    else:
        n1_col = n1_ns.reshape(b_pad, 1)
        n2_col = n2_ns.reshape(b_pad, 1)

    # Precomputed (row, col) of each flattened element; values past F naturally exceed N1,
    # so the out-of-bounds feature region is masked without any extra handling.
    idx = jnp.arange(f_total, dtype=jnp.int32)
    row_arr = (idx // jnp.int32(N2)).reshape(1, f_total)
    col_arr = (idx % jnp.int32(N2)).reshape(1, f_total)

    kernel = functools.partial(_bce_loss_kernel, binary_labels=binary_labels)

    bytes_in = B * F * (pred_perm.dtype.itemsize + gt_perm.dtype.itemsize)
    cost = pl.CostEstimate(
        flops=12 * B * F,
        transcendentals=(1 if binary_labels else 2) * B * F,
        bytes_accessed=bytes_in + gf * gb * 8 * 128 * 4 + 8 * f_total,
    )

    # Grid: (feature blocks, batch blocks) with batch as the FAST axis, so row/col blocks
    # (indexed only by the feature block) are not re-DMA'd on consecutive steps.
    partials = pl.pallas_call(
        kernel,
        out_shape=jax.ShapeDtypeStruct((gf * gb, 8, 128), jnp.float32),
        grid_spec=pltpu.PrefetchScalarGridSpec(
            num_scalar_prefetch=0,
            grid=(gf, gb),
            in_specs=[
                pl.BlockSpec((bt, f_tile), lambda jf, ib: (ib, jf)),
                pl.BlockSpec((bt, f_tile), lambda jf, ib: (ib, jf)),
                pl.BlockSpec((bt, 1), lambda jf, ib: (ib, 0)),
                pl.BlockSpec((bt, 1), lambda jf, ib: (ib, 0)),
                pl.BlockSpec((1, f_tile), lambda jf, ib: (0, jf)),
                pl.BlockSpec((1, f_tile), lambda jf, ib: (0, jf)),
            ],
            out_specs=pl.BlockSpec((1, 8, 128), lambda jf, ib: (jf * gb + ib, 0, 0)),
        ),
        compiler_params=pltpu.CompilerParams(
            dimension_semantics=("parallel", "parallel"),
            vmem_limit_bytes=int(vmem_limit),
        ),
        cost_estimate=cost,
    )(pred2, gt2, n1_col, n2_col, row_arr, col_arr)

    loss_sum = jnp.sum(partials[:, 0, 0])
    n_sum = jnp.sum(n1_ns).astype(jnp.float32)
    # TODO(synk): the PyTorch module's value-range asserts (0 <= p,gt <= 1) are not replicated.
    return loss_sum / n_sum


def _reference_loss(pred_perm, gt_perm, n1_ns, n2_ns):
    # Pure-JAX reference replicating the PyTorch loop.
    B = pred_perm.shape[0]
    loss = 0.0
    n_sum = 0.0
    for b in range(B):
        n1 = int(n1_ns[b])
        n2 = int(n2_ns[b])
        p = pred_perm[b, :n1, :n2].astype(jnp.float32)
        y = gt_perm[b, :n1, :n2].astype(jnp.float32)
        log_p = jnp.maximum(jnp.log(p), -100.0)
        log_1mp = jnp.maximum(jnp.log(1.0 - p), -100.0)
        loss = loss + jnp.sum(-(y * log_p + (1.0 - y) * log_1mp))
        n_sum = n_sum + float(n1)
    return loss / n_sum


if __name__ == "__main__":
    key = jax.random.PRNGKey(0)
    B, N1, N2 = 2, 16, 16

    k1, k2 = jax.random.split(key)
    # pred in (0, 1) via sigmoid of random logits
    pred_perm = jax.nn.sigmoid(jax.random.normal(k1, (B, N1, N2), dtype=jnp.float32))
    # gt: a 0/1 "permutation-like" matrix (random column assignment per row)
    cols = jax.random.randint(k2, (B, N1), 0, N2)
    gt_perm = jax.nn.one_hot(cols, N2, dtype=jnp.float32)

    n1_ns = jnp.array([12, 16], dtype=jnp.int32)
    n2_ns = jnp.array([16, 10], dtype=jnp.int32)

    loss = regression_loss(pred_perm, gt_perm, n1_ns, n2_ns)
    jax.block_until_ready(loss)

    ref = _reference_loss(pred_perm, gt_perm, n1_ns, n2_ns)
    assert jnp.allclose(loss, ref, rtol=1e-5, atol=1e-5), (loss, ref)

    print("KERNEL_OK")
</pallas_src>

<mosaic_0001>
module attributes {stable_mosaic.version = 11 : i64} {
  func.func @_bce_loss_kernel(%arg0: i32, %arg1: i32, %arg2: memref<2x256xf32, #tpu.memory_space<vmem>>, %arg3: memref<2x256xf32, #tpu.memory_space<vmem>>, %arg4: memref<2x1xi32, #tpu.memory_space<vmem>>, %arg5: memref<2x1xi32, #tpu.memory_space<vmem>>, %arg6: memref<1x256xi32, #tpu.memory_space<vmem>>, %arg7: memref<1x256xi32, #tpu.memory_space<vmem>>, %arg8: memref<1x8x128xf32, #tpu.memory_space<vmem>>) attributes {dimension_semantics = [#tpu.dimension_semantics<parallel>, #tpu.dimension_semantics<parallel>], iteration_bounds = array<i64: 1, 1>, scalar_prefetch = 0 : i64, scratch_operands = 0 : i64, tpu.core_type = #tpu.core_type<tc>, window_params = [{transform_indices = @transform_0, window_bounds = array<i64: 2, 256>}, {transform_indices = @transform_1, window_bounds = array<i64: 2, 256>}, {transform_indices = @transform_2, window_bounds = array<i64: 2, 1>}, {transform_indices = @transform_3, window_bounds = array<i64: 2, 1>}, {transform_indices = @transform_4, window_bounds = array<i64: 1, 256>}, {transform_indices = @transform_5, window_bounds = array<i64: 1, 256>}, {transform_indices = @transform_6, window_bounds = array<i64: 1, 8, 128>}]} {
    %c0 = arith.constant 0 : index
    %c0_0 = arith.constant 0 : index
    %0 = vector.load %arg2[%c0, %c0_0] : memref<2x256xf32, #tpu.memory_space<vmem>>, vector<2x256xf32>
    %c0_1 = arith.constant 0 : index
    %c0_2 = arith.constant 0 : index
    %1 = vector.load %arg3[%c0_1, %c0_2] : memref<2x256xf32, #tpu.memory_space<vmem>>, vector<2x256xf32>
    %c0_3 = arith.constant 0 : index
    %c0_4 = arith.constant 0 : index
    %2 = vector.load %arg4[%c0_3, %c0_4] : memref<2x1xi32, #tpu.memory_space<vmem>>, vector<2x1xi32>
    %c0_5 = arith.constant 0 : index
    %c0_6 = arith.constant 0 : index
    %3 = vector.load %arg5[%c0_5, %c0_6] : memref<2x1xi32, #tpu.memory_space<vmem>>, vector<2x1xi32>
    %c0_7 = arith.constant 0 : index
    %c0_8 = arith.constant 0 : index
    %4 = vector.load %arg6[%c0_7, %c0_8] : memref<1x256xi32, #tpu.memory_space<vmem>>, vector<1x256xi32>
    %c0_9 = arith.constant 0 : index
    %c0_10 = arith.constant 0 : index
    %5 = vector.load %arg7[%c0_9, %c0_10] : memref<1x256xi32, #tpu.memory_space<vmem>>, vector<1x256xi32>
    %6 = vector.broadcast %4 : vector<1x256xi32> to vector<2x256xi32>
    %7 = vector.broadcast %2 : vector<2x1xi32> to vector<2x256xi32>
    %8 = arith.cmpi slt, %6, %7 : vector<2x256xi32>
    %9 = vector.broadcast %5 : vector<1x256xi32> to vector<2x256xi32>
    %10 = vector.broadcast %3 : vector<2x1xi32> to vector<2x256xi32>
    %11 = arith.cmpi slt, %9, %10 : vector<2x256xi32>
    %12 = arith.andi %8, %11 : vector<2x256xi1>
    %cst = arith.constant 5.000000e-01 : f32
    %13 = vector.broadcast %cst : f32 to vector<2x256xf32>
    %14 = arith.select %12, %0, %13 : vector<2x256xi1>, vector<2x256xf32>
    %15 = math.log %14 : vector<2x256xf32>
    %cst_11 = arith.constant -1.000000e+02 : f32
    %16 = vector.broadcast %cst_11 : f32 to vector<2x256xf32>
    %17 = arith.maximumf %15, %16 : vector<2x256xf32>
    %cst_12 = arith.constant 1.000000e+00 : f32
    %18 = vector.broadcast %cst_12 : f32 to vector<2x256xf32>
    %19 = arith.subf %18, %14 : vector<2x256xf32>
    %20 = math.log %19 : vector<2x256xf32>
    %cst_13 = arith.constant -1.000000e+02 : f32
    %21 = vector.broadcast %cst_13 : f32 to vector<2x256xf32>
    %22 = arith.maximumf %20, %21 : vector<2x256xf32>
    %23 = arith.subf %17, %22 : vector<2x256xf32>
    %24 = arith.mulf %1, %23 : vector<2x256xf32>
    %25 = arith.addf %22, %24 : vector<2x256xf32>
    %cst_14 = arith.constant 0.000000e+00 : f32
    %26 = vector.broadcast %cst_14 : f32 to vector<2x256xf32>
    %27 = arith.subf %26, %25 : vector<2x256xf32>
    %cst_15 = arith.constant 0.000000e+00 : f32
    %28 = vector.broadcast %cst_15 : f32 to vector<2x256xf32>
    %29 = arith.select %12, %27, %28 : vector<2x256xi1>, vector<2x256xf32>
    %30 = vector.shape_cast %29 : vector<2x256xf32> to vector<1x2x256xf32>
    %cst_16 = arith.constant dense<0.000000e+00> : vector<1xf32>
    %31 = vector.multi_reduction <add>, %30, %cst_16 [1, 2] : vector<1x2x256xf32> to vector<1xf32>
    %32 = vector.shape_cast %31 : vector<1xf32> to vector<1x1x1xf32>
    %33 = vector.extract %32[0, 0, 0] : f32 from vector<1x1x1xf32>
    %34 = vector.broadcast %33 : f32 to vector<1x8x128xf32>
    %c0_17 = arith.constant 0 : index
    %c0_18 = arith.constant 0 : index
    %c0_19 = arith.constant 0 : index
    %35 = vector.load %arg8[%c0_17, %c0_18, %c0_19] : memref<1x8x128xf32, #tpu.memory_space<vmem>>, vector<1x8x128xf32>
    tpu.vector_store %arg8[%c0_17, %c0_18, %c0_19], %34 {strides = array<i32>} : memref<1x8x128xf32, #tpu.memory_space<vmem>>, vector<1x8x128xf32>,
    return
  }
  func.func @transform_0(%arg0: i32, %arg1: i32) -> (i32, i32) {
    %c0_i32 = arith.constant 0 : i32
    return %arg1, %arg0 : i32, i32
  }
  func.func @transform_1(%arg0: i32, %arg1: i32) -> (i32, i32) {
    %c0_i32 = arith.constant 0 : i32
    return %arg1, %arg0 : i32, i32
  }
  func.func @transform_2(%arg0: i32, %arg1: i32) -> (i32, i32) {
    %c0_i32 = arith.constant 0 : i32
    %c0_i32_0 = arith.constant 0 : i32
    return %arg1, %c0_i32 : i32, i32
  }
  func.func @transform_3(%arg0: i32, %arg1: i32) -> (i32, i32) {
    %c0_i32 = arith.constant 0 : i32
    %c0_i32_0 = arith.constant 0 : i32
    return %arg1, %c0_i32 : i32, i32
  }
  func.func @transform_4(%arg0: i32, %arg1: i32) -> (i32, i32) {
    %c0_i32 = arith.constant 0 : i32
    %c0_i32_0 = arith.constant 0 : i32
    return %c0_i32, %arg0 : i32, i32
  }
  func.func @transform_5(%arg0: i32, %arg1: i32) -> (i32, i32) {
    %c0_i32 = arith.constant 0 : i32
    %c0_i32_0 = arith.constant 0 : i32
    return %c0_i32, %arg0 : i32, i32
  }
  func.func @transform_6(%arg0: i32, %arg1: i32) -> (i32, i32, i32) {
    %c1_i32 = arith.constant 1 : i32
    %0 = arith.muli %arg0, %c1_i32 : i32
    %1 = arith.addi %0, %arg1 : i32
    %c0_i32 = arith.constant 0 : i32
    %c0_i32_0 = arith.constant 0 : i32
    %c0_i32_1 = arith.constant 0 : i32
    return %1, %c0_i32, %c0_i32_0 : i32, i32, i32
  }
}

</mosaic_0001>

<bundles_post_ra>
// kernel: tpu_custom_call.1
= control target key start
LH: loop header
LB: loop body
LE: loop exit
PB: predicated region body
PF: predicated region fallthrough
CT: control target
= control target key end

     0   :  { %11 = vsyncpa [#allocation3], 0  ;;  %s552_s0 = inlined_call_operand.hbm [shape: f32[2,256], index: 0, kind: input, shape index: {}]   ;;  %s553_s1 = inlined_call_operand.hbm [shape: f32[2,256], index: 1, kind: input, shape index: {}]   ;;  %s554_s2 = inlined_call_operand.hbm [shape: s32[2,1], index: 2, kind: input, shape index: {}]   ;;  %s555_s3 = inlined_call_operand.hbm [shape: s32[2,1], index: 3, kind: input, shape index: {}]   ;;  %s556_s4 = inlined_call_operand.hbm [shape: s32[1,256], index: 4, kind: input, shape index: {}]   ;;  %s557_s5 = inlined_call_operand.hbm [shape: s32[1,256], index: 5, kind: input, shape index: {}]   ;;  %s558_s6 = inlined_call_operand.hbm [shape: f32[1,8,128], index: 6, kind: output, shape index: {}]  }
   0x1   :  { %12 = vsyncpa [#allocation6], 0 }
   0x2   :  { %13 = vsyncpa [#allocation9], 0 }
   0x3   :  { %14 = vsyncpa [#allocation12], 0 }
   0x4   :  { %15 = vsyncpa [#allocation4], 0  ;;  %s408_s21 = smov [#allocation5]   ;;  %s409_s23 = smov [#allocation8]  }
   0x5   :  { %s32_s22 = sshll.u32 %s408_s21, 4  ;;  %s52_s24 = sshll.u32 %s409_s23, 4  ;;  %s33_s22 = int_to_ptr.vmem [resolvable:$true] %s32_s22  ;;  %s53_s24 = int_to_ptr.vmem [resolvable:$true] %s52_s24 }
   0x6   :  { %s244_s27 = scalar_lea.hbm %s553_s1, 64 }
   0x7   :  { %p245_p0 = scmp.ne.s32.totalorder %s553_s1, %s244_s27  ;;  %p248_p1 = scmp.lt.u32.totalorder %s244_s27, %s553_s1 }
   0x9   :  { %p250_p2 = pnand %p248_p1, %p245_p0 }
   0xb   :  { %253 = shalt.err (!%p250_p2)
}
   0xc   :  { %s254_s8 = scalar_lea.vmem %s33_s22, 64  ;;  %p259_p4 = scmp.lt.s32.totalorder %s33_s22, %s33_s22 }
   0xd   :  { %p255_p3 = scmp.ne.s32.totalorder %s33_s22, %s254_s8  ;;  %p260_p5 = scmp.lt.s32.totalorder %s254_s8, %s254_s8 }
   0xf   :  { %p261_p6 = por %p260_p5, %p259_p4 }
  0x11   :  { %p262_p7 = pnand %p261_p6, %p255_p3 }
  0x13   :  { %265 = shalt.err (!%p262_p7)
}
  0x14   :  { %35 = dma.hbm_to_vmem [thread:$0]  %s553_s1, 64, %s33_s22, [#allocation6]  }
  0x15   :  { %s266_s13 = scalar_lea.hbm %s555_s3, 32 }
  0x16   :  { %p267_p8 = scmp.ne.s32.totalorder %s555_s3, %s266_s13  ;;  %p270_p9 = scmp.lt.u32.totalorder %s266_s13, %s555_s3 }
  0x18   :  { %p272_p10 = pnand %p270_p9, %p267_p8 }
  0x1a   :  { %275 = shalt.err (!%p272_p10)
}
  0x1b   :  { %s276_s18 = scalar_lea.vmem %s53_s24, 32  ;;  %p281_p12 = scmp.lt.s32.totalorder %s53_s24, %s53_s24 }
  0x1c   :  { %p277_p11 = scmp.ne.s32.totalorder %s53_s24, %s276_s18  ;;  %p282_p13 = scmp.lt.s32.totalorder %s276_s18, %s276_s18 }
  0x1e   :  { %p283_p0 = por %p282_p13, %p281_p12 }
  0x20   :  { %p284_p1 = pnand %p283_p0, %p277_p11 }
  0x22   :  { %287 = shalt.err (!%p284_p1)
}
  0x23   :  { %55 = dma.hbm_to_vmem [thread:$0]  %s555_s3, 32, %s53_s24, [#allocation9]  }
  0x24   :  { %s410_s20 = smov [#allocation2]   ;;  %s411_s22 = smov [#allocation7]  }
  0x25   :  { %s22_s21 = sshll.u32 %s410_s20, 4  ;;  %s42_s23 = sshll.u32 %s411_s22, 4  ;;  %s23_s21 = int_to_ptr.vmem [resolvable:$true] %s22_s21  ;;  %s43_s23 = int_to_ptr.vmem [resolvable:$true] %s42_s23 }
  0x26   :  { %s288_s27 = scalar_lea.hbm %s552_s0, 64 }
  0x27   :  { %p289_p2 = scmp.ne.s32.totalorder %s552_s0, %s288_s27  ;;  %p292_p3 = scmp.lt.u32.totalorder %s288_s27, %s552_s0 }
  0x29   :  { %p294_p4 = pnand %p292_p3, %p289_p2 }
  0x2b   :  { %297 = shalt.err (!%p294_p4)
}
  0x2c   :  { %s298_s3 = scalar_lea.vmem %s23_s21, 64  ;;  %p303_p6 = scmp.lt.s32.totalorder %s23_s21, %s23_s21 }
  0x2d   :  { %p299_p5 = scmp.ne.s32.totalorder %s23_s21, %s298_s3  ;;  %p304_p7 = scmp.lt.s32.totalorder %s298_s3, %s298_s3 }
  0x2f   :  { %p305_p8 = por %p304_p7, %p303_p6 }
  0x31   :  { %p306_p9 = pnand %p305_p8, %p299_p5 }
  0x33   :  { %309 = shalt.err (!%p306_p9)
}
  0x34   :  { %25 = dma.hbm_to_vmem [thread:$0]  %s552_s0, 64, %s23_s21, [#allocation3]  }
  0x35   :  { %s310_s11 = scalar_lea.hbm %s554_s2, 32 }
  0x36   :  { %p311_p10 = scmp.ne.s32.totalorder %s554_s2, %s310_s11  ;;  %p314_p11 = scmp.lt.u32.totalorder %s310_s11, %s554_s2 }
  0x38   :  { %p316_p12 = pnand %p314_p11, %p311_p10 }
  0x3a   :  { %319 = shalt.err (!%p316_p12)
}
  0x3b   :  { %s320_s16 = scalar_lea.vmem %s43_s23, 32  ;;  %p325_p0 = scmp.lt.s32.totalorder %s43_s23, %s43_s23 }
  0x3c   :  { %p321_p13 = scmp.ne.s32.totalorder %s43_s23, %s320_s16  ;;  %p326_p1 = scmp.lt.s32.totalorder %s320_s16, %s320_s16 }
  0x3e   :  { %p327_p2 = por %p326_p1, %p325_p0 }
  0x40   :  { %p328_p3 = pnand %p327_p2, %p321_p13 }
  0x42   :  { %331 = shalt.err (!%p328_p3)
}
  0x43   :  { %45 = dma.hbm_to_vmem [thread:$0]  %s554_s2, 32, %s43_s23, [#allocation6]  }
  0x44   :  { %s412_s18 = smov [#allocation10]   ;;  %s413_s19 = smov [#allocation11]  }
  0x45   :  { %s62_s1 = sshll.u32 %s412_s18, 4  ;;  %s72_s20 = sshll.u32 %s413_s19, 4  ;;  %s63_s1 = int_to_ptr.vmem [resolvable:$true] %s62_s1  ;;  %s73_s20 = int_to_ptr.vmem [resolvable:$true] %s72_s20 }
  0x46   :  { %s332_s25 = scalar_lea.hbm %s556_s4, 32 }
  0x47   :  { %p333_p4 = scmp.ne.s32.totalorder %s556_s4, %s332_s25  ;;  %p336_p5 = scmp.lt.u32.totalorder %s332_s25, %s556_s4 }
  0x49   :  { %p338_p6 = pnand %p336_p5, %p333_p4 }
  0x4b   :  { %341 = shalt.err (!%p338_p6)
}
  0x4c   :  { %s342_s2 = scalar_lea.vmem %s63_s1, 32  ;;  %p347_p8 = scmp.lt.s32.totalorder %s63_s1, %s63_s1 }
  0x4d   :  { %p343_p7 = scmp.ne.s32.totalorder %s63_s1, %s342_s2  ;;  %p348_p9 = scmp.lt.s32.totalorder %s342_s2, %s342_s2 }
  0x4f   :  { %p349_p10 = por %p348_p9, %p347_p8 }
  0x51   :  { %p350_p11 = pnand %p349_p10, %p343_p7 }
  0x53   :  { %353 = shalt.err (!%p350_p11)
}
  0x54   :  { %65 = dma.hbm_to_vmem [thread:$0]  %s556_s4, 32, %s63_s1, [#allocation9]  }
  0x55   :  { %s354_s24 = scalar_lea.hbm %s557_s5, 32 }
  0x56   :  { %p355_p12 = scmp.ne.s32.totalorder %s557_s5, %s354_s24  ;;  %p358_p13 = scmp.lt.u32.totalorder %s354_s24, %s557_s5 }
  0x58   :  { %p360_p0 = pnand %p358_p13, %p355_p12 }
  0x5a   :  { %363 = shalt.err (!%p360_p0)
}
  0x5b   :  { %s364_s12 = scalar_lea.vmem %s73_s20, 32  ;;  %p369_p2 = scmp.lt.s32.totalorder %s73_s20, %s73_s20 }
  0x5c   :  { %p365_p1 = scmp.ne.s32.totalorder %s73_s20, %s364_s12  ;;  %p370_p3 = scmp.lt.s32.totalorder %s364_s12, %s364_s12 }
  0x5e   :  { %p371_p4 = por %p370_p3, %p369_p2 }
  0x60   :  { %p372_p5 = pnand %p371_p4, %p365_p1 }
  0x62   :  { %375 = shalt.err (!%p372_p5)
}
  0x63   :  { %75 = dma.hbm_to_vmem [thread:$0]  %s557_s5, 32, %s73_s20, [#allocation12]  }
  0x64   :  { %398 = dma.done.wait [#allocation3], 64  }
  0x65   :  { %399 = vsyncadd [#allocation3], 4294967232 }
  0x66   :  { %400 = dma.done.wait [#allocation6], 96  }
  0x67   :  { %401 = vsyncadd [#allocation6], 4294967200 }
  0x68   :  { %402 = dma.done.wait [#allocation9], 64  }
  0x69   :  { %403 = vsyncadd [#allocation9], 4294967232 }
  0x6a   :  { %404 = dma.done.wait [#allocation12], 32  }
  0x6b   :  { %405 = vsyncadd [#allocation12], 4294967264  ;;  %v414_v0 = vmov 0   ;;  %v97_v1 = vld [vmem:[#allocation7] sm:$0x3]  ;;  %v101_v3 = vlaneseq  ;;  %vm187_vm6 = vcmask 1041408  }
  0x6c   :  { %235 = vset.pattern.permute.xlu0 %v414_v0  ;;  %v98_v2 = vld [vmem:[#allocation8] sm:$0x3]  ;;  %v99_v6 = vld [vmem:[#allocation10] sm:$0x3]  ;;  %v100_v8 = vld [vmem:[#allocation11] sm:$0x3] }
  0x6d   :  { %110 = vperm.xlu0 %235, %v97_v1   ;;  %v102_v4 = vshrl.u32 %v101_v3, 7  ;;  %v223_v13 = vld.sshfl [vmem:[#allocation2] sm:$0x33 pattern:$0x76325410]  ;;  %s416_s5 = smov [#allocation13]  }
  0x6e   :  { %v137_v16 = vcombine.high %v223_v13, %v223_v13  ;;  %v415_v24 = vmov 1983009808   ;;  %v96_v42 = vld [vmem:[#allocation5] sm:$0xf]  ;;  %s211_s14 = sshll.u32 %s416_s5, 4  ;;  %s212_s14 = int_to_ptr.vmem [resolvable:$true] %s211_s14 }
  0x6f   :  { %v103_v5 = vsub.s32 0, %v102_v4  ;;  %v107_v7 = vsub.s32 1, %v102_v4  ;;  %v162_v25 = vunpack.c.l.s4 %v415_v24  ;;  %s376_s16 = scalar_lea.vmem %s212_s14, 128  ;;  %p381_p7 = scmp.lt.s32.totalorder %s212_s14, %s212_s14 }
  0x70   :  { %p377_p6 = scmp.ne.s32.totalorder %s212_s14, %s376_s16  ;;  %p382_p8 = scmp.lt.s32.totalorder %s376_s16, %s376_s16 }
  0x71   :  { %123 = vperm.xlu0 %235, %v98_v2   ;;  %v104_v10 = vrot.slane %v99_v6, %v103_v5  ;;  %v117_v11 = vrot.slane %v100_v8, %v103_v5  ;;  %v121_v12 = vrot.slane %v100_v8, %v107_v7  ;;  %v108_v14 = vrot.slane %v99_v6, %v107_v7 }
  0x72   :  { %v163_v33 = vunpack.c.0.s8 %v162_v25  ;;  %p383_p9 = por %p382_p8, %p381_p7 }
  0x74   :  { %v166_v40 = vsub.s32 %v163_v33, %v102_v4  ;;  %p384_p10 = pnand %p383_p9, %p377_p6 }
  0xec   :  { %v111_v9 = vpop.permute.xlu0 %110 }
  0xed   :  { %vm112_vm0 = vcmp.lt.s32.totalorder %v104_v10, %v111_v9  ;;  %vm113_vm3 = vcmp.lt.s32.totalorder %v108_v14, %v111_v9 }
  0xf0   :  { %v124_v15 = vpop.permute.xlu0 %123 }
  0xf1   :  { %vm125_vm1 = vcmp.lt.s32.totalorder %v117_v11, %v124_v15  ;;  %vm126_vm2 = vcmp.lt.s32.totalorder %v121_v12, %v124_v15 }
  0xf2   :  { %vm524_vm4 = vmand %vm112_vm0, %vm125_vm1 }
  0xf3   :  { %vm528_vm5 = vmand %vm113_vm3, %vm126_vm2  ;;  %v140_v19 = vsel %vm524_vm4, %v223_v13, 0.5 }
  0xf4   :  { %v141_v20 = vsel %vm528_vm5, %v137_v16, 0.5  ;;  %236 = vlog2.f32 %v140_v19  ;;  %v148_v21 = vsub.f32 1.0, %v140_v19 }
  0xf5   :  { %238 = vlog2.f32 %v141_v20  ;;  %v149_v22 = vsub.f32 1.0, %v141_v20 }
  0xf6   :  { %240 = vlog2.f32 %v148_v21 }
  0xf7   :  { %242 = vlog2.f32 %v149_v22 }
  0xfe   :  { %v237_v23 = vpop.eup %236 }
  0xff   :  { %v239_v26 = vpop.eup %238  ;;  %v143_v27 = vmul.f32 0.6931472, %v237_v23 }
 0x100   :  { %v241_v28 = vpop.eup %240  ;;  %v145_v29 = vmul.f32 0.6931472, %v239_v26 }
 0x101   :  { %v243_v30 = vpop.eup %242  ;;  %v151_v31 = vmul.f32 0.6931472, %v241_v28  ;;  %v146_v34 = vmax.f32 %v143_v27, -100.0 }
 0x102   :  { %v153_v32 = vmul.f32 0.6931472, %v243_v30  ;;  %v147_v36 = vmax.f32 %v145_v29, -100.0 }
 0x103   :  { %v154_v35 = vmax.f32 %v151_v31, -100.0 }
 0x104   :  { %v155_v37 = vmax.f32 %v153_v32, -100.0 }
 0x105   :  { %v156_v38 = vsub.f32 %v146_v34, %v154_v35 }
 0x106   :  { %v157_v39 = vsub.f32 %v147_v36, %v155_v37 }
 0x108   :  { %v160_v41 = vcombine.low %v156_v38, %v157_v39 }
 0x10a   :  { %v167_v43 = vrot.slane %v160_v41, %v166_v40 }
 0x10c   :  { %v169_v44 = vmul.f32 %v167_v43, %v96_v42 }
 0x10e   :  { %v177_v45 = vrot.slane %v169_v44, %v166_v40 }
 0x110   :  { %v178_v46 = vcombine.high %v177_v45, %v177_v45  ;;  %v181_v47 = vadd.f32 %v177_v45, %v154_v35 }
 0x112   :  { %v182_v48 = vadd.f32 %v178_v46, %v155_v37  ;;  %v183_v49 = vsub.f32 0.0, %v181_v47 }
 0x114   :  { %v184_v50 = vsub.f32 0.0, %v182_v48  ;;  %v185_v51 = vsel %vm524_vm4, %v183_v49, 0.0 }
 0x115   :  { %v188_v53 = vsel %vm187_vm6, %v185_v51, 0.0 }
 0x116   :  { %v186_v52 = vsel %vm528_vm5, %v184_v50, 0.0 }
 0x117   :  { %v189_v54 = vsel %vm187_vm6, %v186_v52, 0.0 }
 0x118   :  { %v190_v55 = vadd.f32 %v189_v54, %v188_v53 }
 0x11a   :  { %191 = vadd.xlane.f32.xlu1 %v190_v55 }
 0x1a7   :  { %v192_v56 = vpop.xlane.xlu1 %191 }
 0x1a8   :  { %v193_v57 = vrot.slane %v192_v56, 4 }
 0x1aa   :  { %v194_v58 = vadd.f32 %v193_v57, %v192_v56 }
 0x1ac   :  { %v195_v59 = vrot.slane %v194_v58, 2 }
 0x1ae   :  { %v196_v60 = vadd.f32 %v195_v59, %v194_v58 }
 0x1b0   :  { %v197_v61 = vrot.slane %v196_v60, 1 }
 0x1b2   :  { %v198_v62 = vadd.f32 %v197_v61, %v196_v60 }
 0x1b4   :  { %224 = vpush %v198_v62 }
 0x1e5   :  { %s225_s15 = spop %224 }
 0x1e6   :  { %v200_v63 = vstv %s225_s15 }
 0x1e7   :  { %201 = vst [vmem:[#allocation13] sm:$0xff] %v200_v63 }
 0x1e8   :  { %387 = shalt.err (!%p384_p10)
}
 0x1e9   :  { %s388_s18 = scalar_lea.hbm %s558_s6, 128 }
 0x1ea   :  { %p389_p11 = scmp.ne.s32.totalorder %s558_s6, %s388_s18  ;;  %p392_p12 = scmp.lt.u32.totalorder %s388_s18, %s558_s6 }
 0x1ec   :  { %p394_p13 = pnand %p392_p12, %p389_p11 }
 0x1ee   :  { %397 = shalt.err (!%p394_p13)
}
 0x1ef   :  { %214 = dma.vmem_to_hbm [thread:$0]  %s212_s14, 128, %s558_s6, [#allocation4]  }
 0x1f0   :  { %406 = dma.done.wait [#allocation4], 128  }
 0x1f1   :  { %407 = vsyncadd [#allocation4], 4294967168 }
 0x1f2   :  { %218 = vsyncpa [#allocation3], 1 }
 0x1f3   :  { %219 = vsyncpa [#allocation6], 1 }
 0x1f4   :  { %220 = vsyncpa [#allocation9], 1 }
 0x1f5   :  { %221 = vsyncpa [#allocation12], 1 }
 0x1f6   :  { %222 = vsyncpa [#allocation4], 1 }

</bundles_post_ra>
